<compile_context>
chip_gen: v5e
topology: v5e:2x2
jax: 0.10.0
libtpu: 0.0.40
codegen_flags: <defaults>
</compile_context>

<pallas_src>
import jax
import jax.numpy as jnp
from jax.experimental import pallas as pl
from jax.experimental.pallas import tpu as pltpu


def _scale_kernel(x_ref, g_ref, o_ref):
    # x_ref: (tr, tc) in x.dtype; g_ref: (tr, 1) f32 per-row gate.
    xb = x_ref[...].astype(jnp.float32)
    o_ref[...] = (xb * g_ref[...]).astype(o_ref.dtype)


def _pick_tile(dim, align, pref):
    """Largest multiple of `align` that divides `dim` and is <= pref.
    Falls back to the full dim (always legal as a block size) when `dim`
    is not a multiple of `align`."""
    if dim % align != 0:
        return dim
    t = min(pref, dim)
    t = (t // align) * align
    while dim % t != 0:
        t -= align
    return max(t, align)


def _compute_gate(x_flat, w1, b1, w2, b2):
    """x_flat: (N, C, HW). Returns the (N, C) sigmoid gate in float32."""
    mean = jnp.mean(x_flat.astype(jnp.float32), axis=-1)            # (N, C)
    h = jnp.maximum(jnp.dot(mean, w1.T,
                            preferred_element_type=jnp.float32) + b1, 0.0)  # (N, S)
    g = jnp.dot(h, w2.T, preferred_element_type=jnp.float32) + b2   # (N, C)
    return jax.nn.sigmoid(g)                                        # (N, C) f32


def se_forward(x, w1, b1, w2, b2):
    """x: (N, C, H, W); w1: (S, C); b1: (S,); w2: (C, S); b2: (C,)."""
    N, C, H, W = x.shape
    HW = H * W
    R = N * C

    # --- squeeze + excite (tiny): precompute per-(n, c) gate in plain XLA ---
    gate = _compute_gate(x.reshape(N, C, HW), w1, b1, w2, b2)       # (N, C) f32
    gate2d = gate.reshape(R, 1)

    # --- scale (memory-bound): Pallas kernel over lane-dense (R, HW) ---
    x2d = x.reshape(R, HW)
    tr = _pick_tile(R, 8, 256)      # sublane tile (multiple of 8 or full R)
    tc = _pick_tile(HW, 128, 1024)  # lane tile (multiple of 128 or full HW)

    out2d = pl.pallas_call(
        _scale_kernel,
        out_shape=jax.ShapeDtypeStruct((R, HW), x.dtype),
        grid_spec=pltpu.PrefetchScalarGridSpec(
            num_scalar_prefetch=0,
            grid=(R // tr, HW // tc),
            in_specs=[
                pl.BlockSpec((tr, tc), lambda i, j: (i, j)),
                pl.BlockSpec((tr, 1), lambda i, j: (i, 0)),
            ],
            out_specs=pl.BlockSpec((tr, tc), lambda i, j: (i, j)),
        ),
        compiler_params=pltpu.CompilerParams(
            dimension_semantics=("parallel", "parallel")),
    )(x2d, gate2d)
    return out2d.reshape(N, C, H, W)


def se_reference(x, w1, b1, w2, b2):
    """Pure-JAX reference matching PyTorch SE.forward semantics."""
    mean = jnp.mean(x, axis=(2, 3), keepdims=True)                  # (N,C,1,1)
    h = jnp.einsum('sc,nchw->nshw', w1, mean) + b1[None, :, None, None]
    h = jnp.maximum(h, 0.0)
    g = jnp.einsum('cs,nshw->nchw', w2, h) + b2[None, :, None, None]
    gate = jax.nn.sigmoid(g)
    return x * gate


if __name__ == "__main__":
    key = jax.random.PRNGKey(0)
    N, C, H, W = 2, 4, 16, 16   # w_in = C = 4
    S = 8                        # w_se = 8

    kx, k1, kb1, k2, kb2 = jax.random.split(key, 5)
    x = jax.random.normal(kx, (N, C, H, W), dtype=jnp.float32)
    # Conv2d(C, S, kernel_size=1, bias=True): weight (S, C, 1, 1) -> (S, C)
    w1 = jax.random.normal(k1, (S, C), dtype=jnp.float32) * 0.5
    b1 = jax.random.normal(kb1, (S,), dtype=jnp.float32) * 0.1
    # Conv2d(S, C, kernel_size=1, bias=True): weight (C, S, 1, 1) -> (C, S)
    w2 = jax.random.normal(k2, (C, S), dtype=jnp.float32) * 0.5
    b2 = jax.random.normal(kb2, (C,), dtype=jnp.float32) * 0.1

    se_jit = jax.jit(se_forward)
    out = jax.block_until_ready(se_jit(x, w1, b1, w2, b2))

    ref = se_reference(x, w1, b1, w2, b2)
    assert out.shape == x.shape
    assert jnp.allclose(out, ref, atol=1e-5, rtol=1e-5), "mismatch vs reference"
    print("KERNEL_OK")
</pallas_src>

<mosaic_0001>
module attributes {stable_mosaic.version = 11 : i64} {
  func.func @_scale_kernel(%arg0: i32, %arg1: i32, %arg2: memref<8x256xf32, #tpu.memory_space<vmem>>, %arg3: memref<8x1xf32, #tpu.memory_space<vmem>>, %arg4: memref<8x256xf32, #tpu.memory_space<vmem>>) attributes {dimension_semantics = [#tpu.dimension_semantics<parallel>, #tpu.dimension_semantics<parallel>], iteration_bounds = array<i64: 1, 1>, scalar_prefetch = 0 : i64, scratch_operands = 0 : i64, tpu.core_type = #tpu.core_type<tc>, window_params = [{transform_indices = @transform_0, window_bounds = array<i64: 8, 256>}, {transform_indices = @transform_1, window_bounds = array<i64: 8, 1>}, {transform_indices = @transform_2, window_bounds = array<i64: 8, 256>}]} {
    %c0 = arith.constant 0 : index
    %c0_0 = arith.constant 0 : index
    %0 = vector.load %arg2[%c0, %c0_0] : memref<8x256xf32, #tpu.memory_space<vmem>>, vector<8x256xf32>
    %c0_1 = arith.constant 0 : index
    %c0_2 = arith.constant 0 : index
    %1 = vector.load %arg3[%c0_1, %c0_2] : memref<8x1xf32, #tpu.memory_space<vmem>>, vector<8x1xf32>
    %2 = vector.broadcast %1 : vector<8x1xf32> to vector<8x256xf32>
    %3 = arith.mulf %0, %2 : vector<8x256xf32>
    %c0_3 = arith.constant 0 : index
    %c0_4 = arith.constant 0 : index
    %4 = vector.load %arg4[%c0_3, %c0_4] : memref<8x256xf32, #tpu.memory_space<vmem>>, vector<8x256xf32>
    tpu.vector_store %arg4[%c0_3, %c0_4], %3 {strides = array<i32>} : memref<8x256xf32, #tpu.memory_space<vmem>>, vector<8x256xf32>,
    return
  }
  func.func @transform_0(%arg0: i32, %arg1: i32) -> (i32, i32) {
    %c0_i32 = arith.constant 0 : i32
    return %arg0, %arg1 : i32, i32
  }
  func.func @transform_1(%arg0: i32, %arg1: i32) -> (i32, i32) {
    %c0_i32 = arith.constant 0 : i32
    %c0_i32_0 = arith.constant 0 : i32
    return %arg0, %c0_i32 : i32, i32
  }
  func.func @transform_2(%arg0: i32, %arg1: i32) -> (i32, i32) {
    %c0_i32 = arith.constant 0 : i32
    return %arg0, %arg1 : i32, i32
  }
}

</mosaic_0001>

<bundles_post_ra>
// kernel: se_forward.1
= control target key start
LH: loop header
LB: loop body
LE: loop exit
PB: predicated region body
PF: predicated region fallthrough
CT: control target
= control target key end

     0   :  { %v29_v0 = vmov 0   ;;  %s60_s1 = inlined_call_operand.vmem [shape: f32[8,1], index: 1, kind: input, shape index: {}]   ;;  %s61_s0 = inlined_call_operand.vmem [shape: f32[8,256], index: 0, kind: input, shape index: {}]   ;;  %s62_s2 = inlined_call_operand.vmem [shape: f32[8,256], index: 2, kind: output, shape index: {}]  }
   0x1   :  { %28 = vset.pattern.permute.xlu0 %v29_v0  ;;  %v13_v1 = vld [vmem:[%s60_s1] sm:$0xff]  ;;  %v12_v3 = vld [vmem:[%s61_s0 + $0x8] sm:$0xff] }
   0x2   :  { %16 = vperm.xlu0 %28, %v13_v1   ;;  %v11_v2 = vld [vmem:[%s61_s0] sm:$0xff] }
  0x74   :  { %v17_v4 = vpop.permute.xlu0 %16 }
  0x75   :  { %v19_v5 = vmul.f32 %v17_v4, %v11_v2  ;;  %v20_v6 = vmul.f32 %v17_v4, %v12_v3 }
  0x77   :  { %21 = vst [vmem:[%s62_s2] sm:$0xff] %v19_v5 }
  0x78   :  { %22 = vst [vmem:[%s62_s2 + $0x8] sm:$0xff] %v20_v6 }

</bundles_post_ra>
